<compile_context>
chip_gen: v7x
topology: tpu7x:2x2x1
jax: 0.10.0
libtpu: 0.0.40
codegen_flags: <defaults>
</compile_context>

<pallas_src>
import numpy as np
import jax
import jax.numpy as jnp
from jax.experimental import pallas as pl
from jax.experimental.pallas import tpu as pltpu


# ---- deterministic parameter init: standard JPEG chrominance table ----------
def make_c_table() -> np.ndarray:
    c_table = np.empty((8, 8), dtype=np.float32)
    c_table.fill(99.0)
    c_table[:4, :4] = np.array(
        [[17, 18, 24, 47],
         [18, 21, 26, 66],
         [24, 26, 56, 99],
         [47, 66, 99, 99]], dtype=np.float32).T
    return c_table


# ---- Pallas kernel -----------------------------------------------------------
def c_quantize_kernel(img_ref, inv_ref, out_ref):
    # img_ref: (tr, 128) VMEM tile of flattened 8x8 blocks (lane-dense)
    # inv_ref: (1, 128)  precomputed 1/(c_table*factor), tiled twice per row
    x = img_ref[...] * inv_ref[...]      # broadcast over sublanes
    r = jnp.round(x)                     # round-half-to-even == torch.round
    d = x - r
    out_ref[...] = r + d * d * d         # diff_round: two VALU muls, no pow


def c_quantize(image: jax.Array, c_table: jax.Array,
               factor: float = 1.0, tile_rows: int = 16384) -> jax.Array:
    """image: (N, 8, 8) float32; c_table: (8, 8) float32."""
    orig_shape = image.shape
    assert orig_shape[-2:] == (8, 8), "expects a batch of 8x8 blocks"
    image = image.astype(jnp.float32)

    # Hoist table math out of the kernel: reciprocal + factor folded once.
    inv_table = 1.0 / (c_table.astype(jnp.float32) * jnp.float32(factor))
    # Row-major flatten of the (8,8) table, repeated twice -> one 128-lane row.
    inv_row = jnp.tile(inv_table.reshape(-1), 2).reshape(1, 128)

    # Lane-dense 2D layout: (N*64,) -> (rows, 128).
    flat = image.reshape(-1)
    total = flat.shape[0]                        # N * 64
    rows = pl.cdiv(total, 128)
    pad = rows * 128 - total                     # 0 when N even, else 64
    if pad:
        flat = jnp.pad(flat, (0, pad))           # tiny tail pad only
    x2d = flat.reshape(rows, 128)

    # Tile rows: multiple of 8 (or == rows for tiny inputs); clamp so the
    # parallel grid axis has >=2 steps (keeps both v7x TensorCores busy),
    # capped at tile_rows to bound VMEM residency.
    if rows <= 8:
        tr = rows                                # block == full array extent
    else:
        half = ((pl.cdiv(rows, 2) + 7) // 8) * 8
        tr = min(tile_rows, half)
    grid = (pl.cdiv(rows, tr),)                  # ragged last block is clipped

    # in+out, double-buffered, + slack; stays under v7x's 64 MiB physical VMEM.
    vmem_limit = int(min(4 * tr * 128 * 4 + (4 << 20), 60 << 20))

    out2d = pl.pallas_call(
        c_quantize_kernel,
        out_shape=jax.ShapeDtypeStruct((rows, 128), jnp.float32),
        grid=grid,
        in_specs=[
            pl.BlockSpec((tr, 128), lambda i: (i, 0)),
            pl.BlockSpec((1, 128), lambda i: (0, 0)),   # table row: resident
        ],
        out_specs=pl.BlockSpec((tr, 128), lambda i: (i, 0)),
        compiler_params=pltpu.CompilerParams(
            dimension_semantics=("parallel",),
            vmem_limit_bytes=vmem_limit,
        ),
    )(x2d, inv_row)

    out_flat = out2d.reshape(-1)
    if pad:
        out_flat = out_flat[:total]              # slice only when padded
    return out_flat.reshape(orig_shape)


# ---- reference (plain JAX) ---------------------------------------------------
def ref_c_quantize(x, table, factor=1.0):
    xr = x.astype(jnp.float32) / (table[None, :, :] * factor)
    r = jnp.round(xr)
    return r + (xr - r) ** 3


if __name__ == "__main__":
    key = jax.random.PRNGKey(0)
    table = jnp.asarray(make_c_table())

    # 2 images x 16 8x8 chroma blocks each = 32 blocks (even -> no padding)
    x = jax.random.normal(key, (32, 8, 8), dtype=jnp.float32) * 128.0
    out = jax.block_until_ready(c_quantize(x, table))
    np.testing.assert_allclose(np.asarray(out),
                               np.asarray(ref_c_quantize(x, table)),
                               rtol=1e-6, atol=1e-6)

    # odd block count exercises the 64-element tail pad + output slice path
    x_odd = jax.random.normal(jax.random.PRNGKey(1), (13, 8, 8),
                              dtype=jnp.float32) * 128.0
    out_odd = jax.block_until_ready(c_quantize(x_odd, table))
    np.testing.assert_allclose(np.asarray(out_odd),
                               np.asarray(ref_c_quantize(x_odd, table)),
                               rtol=1e-6, atol=1e-6)

    # block count that leaves a ragged (clipped) boundary tile: rows=20, tr=16
    x_rag = jax.random.normal(jax.random.PRNGKey(2), (40, 8, 8),
                              dtype=jnp.float32) * 128.0
    out_rag = jax.block_until_ready(c_quantize(x_rag, table))
    np.testing.assert_allclose(np.asarray(out_rag),
                               np.asarray(ref_c_quantize(x_rag, table)),
                               rtol=1e-6, atol=1e-6)

    print("KERNEL_OK")
</pallas_src>

<mosaic_0001>
module attributes {stable_mosaic.version = 11 : i64} {
  func.func @c_quantize_kernel(%arg0: i32, %arg1: memref<8x128xf32, #tpu.memory_space<vmem>>, %arg2: memref<1x128xf32, #tpu.memory_space<vmem>>, %arg3: memref<8x128xf32, #tpu.memory_space<vmem>>) attributes {dimension_semantics = [#tpu.dimension_semantics<parallel>], iteration_bounds = array<i64: 2>, scalar_prefetch = 0 : i64, scratch_operands = 0 : i64, tpu.core_type = #tpu.core_type<tc>, window_params = [{transform_indices = @transform_0, window_bounds = array<i64: 8, 128>}, {pipeline_mode = #tpu.pipeline_mode<synchronous>, transform_indices = @transform_1, window_bounds = array<i64: 1, 128>}, {transform_indices = @transform_2, window_bounds = array<i64: 8, 128>}]} {
    %c0 = arith.constant 0 : index
    %c0_0 = arith.constant 0 : index
    %0 = vector.load %arg1[%c0, %c0_0] : memref<8x128xf32, #tpu.memory_space<vmem>>, vector<8x128xf32>
    %c0_1 = arith.constant 0 : index
    %c0_2 = arith.constant 0 : index
    %1 = vector.load %arg2[%c0_1, %c0_2] : memref<1x128xf32, #tpu.memory_space<vmem>>, vector<1x128xf32>
    %2 = vector.broadcast %1 : vector<1x128xf32> to vector<8x128xf32>
    %3 = arith.mulf %0, %2 : vector<8x128xf32>
    %4 = math.roundeven %3 : vector<8x128xf32>
    %5 = arith.subf %3, %4 : vector<8x128xf32>
    %6 = arith.mulf %5, %5 : vector<8x128xf32>
    %7 = arith.mulf %6, %5 : vector<8x128xf32>
    %8 = arith.addf %4, %7 : vector<8x128xf32>
    %c0_3 = arith.constant 0 : index
    %c0_4 = arith.constant 0 : index
    %9 = vector.load %arg3[%c0_3, %c0_4] : memref<8x128xf32, #tpu.memory_space<vmem>>, vector<8x128xf32>
    tpu.vector_store %arg3[%c0_3, %c0_4], %8 {strides = array<i32>} : memref<8x128xf32, #tpu.memory_space<vmem>>, vector<8x128xf32>,
    return
  }
  func.func @transform_0(%arg0: i32) -> (i32, i32) {
    %c0_i32 = arith.constant 0 : i32
    %c0_i32_0 = arith.constant 0 : i32
    return %arg0, %c0_i32 : i32, i32
  }
  func.func @transform_1(%arg0: i32) -> (i32, i32) {
    %c0_i32 = arith.constant 0 : i32
    %c0_i32_0 = arith.constant 0 : i32
    %c0_i32_1 = arith.constant 0 : i32
    return %c0_i32, %c0_i32_0 : i32, i32
  }
  func.func @transform_2(%arg0: i32) -> (i32, i32) {
    %c0_i32 = arith.constant 0 : i32
    %c0_i32_0 = arith.constant 0 : i32
    return %arg0, %c0_i32 : i32, i32
  }
}

</mosaic_0001>

<bundles_post_ra>
// kernel: tpu_custom_call.1
= control target key start
LH: loop header
LB: loop body
LE: loop exit
PB: predicated region body
PF: predicated region fallthrough
CT: control target
= control target key end

     0   :  { %7 = vsyncpa [#allocation3], 0  ;;  %s597_s0 = inlined_call_operand.hbm [shape: f32[16,128], index: 0, kind: input, shape index: {}]   ;;  %s598_s1 = inlined_call_operand.vmem [shape: f32[1,128], index: 1, kind: input, shape index: {}]   ;;  %s599_s2 = inlined_call_operand.hbm [shape: f32[16,128], index: 2, kind: output, shape index: {}]  }
   0x1   :  { %9 = vsyncpa [#allocation3 + $0x1], 0 }
   0x2   :  { %10 = vsyncpa [#allocation4], 0 }
   0x3   :  { %12 = vsyncpa [#allocation4 + $0x1], 0  ;;  %s433_s9 = smov 0   ;;  %s435_s10 = smov 0  }
   0x4   :  { %s437_s11 = smov 0   ;;  %s439_s12 = smov 0  }
   0x5 LB: > { %s454_s13 = sadd.s32 4294967295, %s414_s12   ;;  %s258_s14 = sadd.s32 4294967294, %s414_s12   ;;  %s414_s12 = sphi %s439_s12, %s614_s12   ;;  %s410_s11 = sphi %s437_s11, %s613_s11   ;;  %s406_s10 = sphi %s435_s10, %s612_s10   ;;  %s402_s9 = sphi %s433_s9, %s611_s9  }
   0x6   : > { %s458_s15 = sadd.s32 1, %s414_s12   ;;  %s25_s16 = sadd.s32 1, %s410_s11 }
   0x7   : > { %s22_s17 = ssub.s32 %s414_s12, %s458_s15  ;;  %p32_p0 = scmp.ne.s32.totalorder %s410_s11, %s406_s10 }
   0x8   : > { %p23_p1 = scmp.eq.s32.totalorder %s22_s17, 0  ;;  %p33_p2 = scmp.eq.s32.totalorder %s414_s12, 0 }
   0x9   : > { %p38_p3 = scmp.ne.s32.totalorder %s406_s10, %s402_s9  ;;  %p39_p4 = scmp.eq.s32.totalorder %s454_s13, 0 }
   0xa   : > { %s470_s18 = scalar_select %p23_p1, %s410_s11, %s25_s16  }
   0xb   : > { %p472_p5 = por %p33_p2, %p32_p0  ;;  %p476_p6 = por %p39_p4, %p38_p3 }
   0xc   : > { %p83_p7 = scmp.eq.s32.totalorder %s454_s13, 1  ;;  %p89_p8 = scmp.eq.s32.totalorder %s258_s14, 1 }
   0xd   : > { %p284_p10 = scmp.lt.s32.totalorder %s414_s12, 2  ;;  %s112_s23 = sand.u32 1, %s410_s11  }
   0xe   : > { %p483_p11 = por %p83_p7, %p32_p0  ;;  %p487_p12 = por %p89_p8, %p38_p3 }
   0xf   : > { %s262_s24 = sshll.u32 %s414_s12, 7  ;;  %s261_s25 = sshll.u32 %s112_s23, 3 }
  0x10   : > { %s603_s21 = scalar_select %p483_p11, 1, 0 }
  0x11   : > { %s604_s22 = scalar_select %p487_p12, 1, 0 }
  0x12   : > { %s496_s28 = scalar_lea.hbm %s597_s0, %s262_s24  ;;  %s116_s29 = scalar_lea.vmem [#allocation2], %s261_s25 }
  0x13   : > { %s123_s30 = sshll.u32 %s116_s29, 4  ;;  %p500_p13 = pnand %p284_p10, %p472_p5  ;;  %s504_s30 = int_to_ptr.vmem [resolvable:$true] %s123_s30 }
  0x14   : > { %s113_s4 = scalar_lea.sflag [#allocation3], %s112_s23  ;;  %s318_s5 = scalar_lea.hbm %s496_s28, 128 }
  0x15   : > { %p319_p2 = scmp.ne.s32.totalorder %s496_s28, %s318_s5  ;;  %p320_p3 = pneg %p500_p13 }
  0x16   : > { %s323_s8 = scalar_lea.hbm %s597_s0, 256  ;;  %p324_p5 = scmp.lt.u32.totalorder %s496_s28, %s597_s0 }
  0x17   : > { %p321_p4 = pnand %p320_p3, %p319_p2  ;;  %p325_p8 = scmp.lt.u32.totalorder %s323_s8, %s318_s5 }
  0x18   : > { %p327_p9 = scmp.lt.u32.totalorder %s318_s5, %s496_s28 }
  0x19   : > { %p322_p7 = pneg %p321_p4  ;;  %p326_p10 = por %p325_p8, %p324_p5 }
  0x1b   : > { %p328_p0 = por %p327_p9, %p326_p10 }
  0x1d   : > { %p329_p1 = pnand %p328_p0, %p322_p7 }
  0x1f   : > { %332 = shalt.err (!%p329_p1)
}
  0x20   : > { %s333_s17 = scalar_lea.vmem %s504_s30, 128  ;;  %s416_s19 = smov [#allocation2]  }
  0x21   : > { %p334_p2 = scmp.ne.s32.totalorder %s504_s30, %s333_s17  ;;  %s338_s23 = sshll.u32 %s416_s19, 4  ;;  %s339_s23 = int_to_ptr.vmem [resolvable:$false] %s338_s23 }
  0x22   : > { %s340_s24 = scalar_lea.vmem %s339_s23, 256  ;;  %p341_p11 = scmp.lt.s32.totalorder %s504_s30, %s339_s23 }
  0x23   : > { %p336_p4 = pnand %p334_p2, %p320_p3  ;;  %p342_p5 = scmp.lt.s32.totalorder %s340_s24, %s333_s17 }
  0x25   : > { %p337_p12 = pneg %p336_p4  ;;  %p343_p8 = por %p342_p5, %p341_p11 }
  0x27   : > { %p344_p9 = pnand %p343_p8, %p337_p12 }
  0x29   : > { %347 = shalt.err (!%p344_p9)
}
  0x2a   : > { %279 = dma.hbm_to_vmem [thread:$0]  (!%p500_p13), %s496_s28, 128, %s504_s30, %s113_s4  }
  0x2b   : > { %p606_p0 = scmp.lt.s32.totalorder %s414_s12, 3  ;;  %p607_p1 = scmp.ge.s32.totalorder %s414_s12, 1 }
  0x2d   : > { %p129_p3 = pnand %p607_p1, %p606_p0 }
  0x2e   : > { %s538_s25 = sand.u32 (!%p129_p3), 1, %s406_s10  }
  0x2f   : > { %132 = sbr.rel (%p129_p3) target bundleno = 83 (0x53), region = 28  ;;  %s264_s26 = sshll.u32 (!%p129_p3), %s538_s25, 3 }
  0x30   : > { %s135_s27 = scalar_lea.sflag (!%p129_p3), [#allocation3], %s538_s25  ;;  %s138_s29 = scalar_lea.vmem (!%p129_p3), [#allocation2], %s264_s26 }
  0x36   : > { %393 = dma.done.wait (%p476_p6), %s135_s27, 128  }
  0x37   : > { %395 = vsyncadd (%p476_p6), %s135_s27, 4294967168  ;;  %v159_v0 = vld [vmem:[%s138_s29] sm:$0xff]  ;;  %s158_s3 = scalar_lea.vmem [#allocation5], %s264_s26  ;;  %s268_s5 = sshll.u32 %s454_s13, 7 }
  0x38   : > { %v266_v1 = vld [vmem:[%s598_s1] ss:$0 sm:$0xff]  ;;  %s188_s4 = sshll.u32 %s158_s3, 4  ;;  %s555_s7 = scalar_lea.hbm %s599_s2, %s268_s5  ;;  %s550_s4 = int_to_ptr.vmem [resolvable:$true] %s188_s4 }
  0x39   : > { %v167_v2 = vmul.f32 %v266_v1, %v159_v0  ;;  %s175_s8 = scalar_lea.sflag [#allocation4], %s538_s25  ;;  %s348_s14 = scalar_lea.vmem %s550_s4, 128 }
  0x3a   : > { %p349_p6 = scmp.ne.s32.totalorder %s550_s4, %s348_s14  ;;  %p608_p11 = scmp.ne.s32.totalorder %s603_s21, 0 }
  0x3b   : > { %v271_v3 = vround.rtne.f32 %v167_v2  ;;  %s417_s13 = smov [#allocation5]  }
  0x3c   : > { %p350_p12 = pnand %p349_p6, %p608_p11  ;;  %s352_s16 = sshll.u32 %s417_s13, 4  ;;  %s353_s16 = int_to_ptr.vmem [resolvable:$false] %s352_s16 }
  0x3d   : > { %v169_v4 = vsub.f32 %v167_v2, %v271_v3  ;;  %s354_s17 = scalar_lea.vmem %s353_s16, 256  ;;  %p355_p7 = scmp.lt.s32.totalorder %s550_s4, %s353_s16 }
  0x3e   : > { %p351_p13 = pneg %p350_p12  ;;  %p356_p10 = scmp.lt.s32.totalorder %s354_s17, %s348_s14 }
  0x3f   : > { %v170_v5 = vmul.f32 %v169_v4, %v169_v4 }
  0x40   : > { %p357_p2 = por %p356_p10, %p355_p7 }
  0x41   : > { %v171_v6 = vmul.f32 %v170_v5, %v169_v4 }
  0x42   : > { %p358_p4 = pnand %p357_p2, %p351_p13 }
  0x43   : > { %v172_v7 = vadd.f32 %v271_v3, %v171_v6 }
  0x45   : > { %173 = vst [vmem:[%s158_s3] sm:$0xff] %v172_v7 }
  0x46   : > { %361 = shalt.err (!%p358_p4)
}
  0x47   : > { %s362_s19 = scalar_lea.hbm %s555_s7, 128  ;;  %s366_s25 = scalar_lea.hbm %s599_s2, 256 }
  0x48   : > { %p363_p5 = scmp.ne.s32.totalorder %s555_s7, %s362_s19  ;;  %p367_p0 = scmp.lt.u32.totalorder %s555_s7, %s599_s2 }
  0x49   : > { %p368_p1 = scmp.lt.u32.totalorder %s366_s25, %s362_s19  ;;  %p370_p6 = scmp.lt.u32.totalorder %s362_s19, %s555_s7 }
  0x4a   : > { %p364_p8 = pnand %p363_p5, %p608_p11 }
  0x4b   : > { %p369_p3 = por %p368_p1, %p367_p0 }
  0x4c   : > { %p365_p9 = pneg %p364_p8 }
  0x4d   : > { %p371_p12 = por %p370_p6, %p369_p3 }
  0x4f   : > { %p372_p13 = pnand %p371_p12, %p365_p9 }
  0x51   : > { %375 = shalt.err (!%p372_p13)
}
  0x52   : > { %274 = dma.vmem_to_hbm [thread:$0]  (%p608_p11), %s550_s4, 128, %s555_s7, %s175_s8  }
  0x53 PF: > { %s200_s29 = sand.u32 1, %s402_s9   ;;  %p609_p7 = scmp.ne.s32.totalorder %s604_s22, 0 }
  0x54   : > { %p610_p10 = scmp.ge.s32.totalorder %s414_s12, 2  ;;  %s201_s28 = scalar_lea.sflag [#allocation4], %s200_s29 }
  0x56   : > { %p281_p2 = pnand %p610_p10, %p609_p7 }
  0x58   : > { %397 = dma.done.wait (!%p281_p2), %s201_s28, 128  }
  0x59   : > { %399 = vsyncadd (!%p281_p2), %s201_s28, 4294967168  ;;  %p15_p4 = scmp.ge.s32.totalorder %s458_s15, 4   ;;  %s611_s9 = smov %s406_s10 }
  0x5a   : > { %s612_s10 = smov %s410_s11  ;;  %s613_s11 = smov %s470_s18 }
  0x5b   : > { %s614_s12 = smov %s458_s15  ;;  %17 = sbr.rel (!%p15_p4) target bundleno = 5 (0x5), region = 73 }
  0x62   :  { %206 = vsyncpa [#allocation3], 1 }
  0x63   :  { %208 = vsyncpa [#allocation3 + $0x1], 1 }
  0x64   :  { %209 = vsyncpa [#allocation4], 1 }
  0x65   :  { %211 = vsyncpa [#allocation4 + $0x1], 1 }

</bundles_post_ra>
